<compile_context>
chip_gen: v7x
topology: tpu7x:2x2x1
jax: 0.10.0
libtpu: 0.0.40
codegen_flags: <defaults>
</compile_context>

<pallas_src>
import functools
import math

import jax
import jax.numpy as jnp
from jax import lax
from jax.experimental import pallas as pl
from jax.experimental.pallas import tpu as pltpu


# --------------------------------------------------------------------------
# Kernel body
# --------------------------------------------------------------------------
def _lowrank_fw_kernel(wl_ref, wr_ref, out_ref, *, add_identity: bool,
                       out_block: int, in_block: int,
                       out_features: int, in_features: int,
                       use_bf16_mxu: bool):
    # wl_ref : (Hb, Ob, R)   resident across the in_features grid axis
    # wr_ref : (Hb, R, Tn)   resident across the out_features grid axis
    # out_ref: (Hb, Ob, Tn)
    wl = wl_ref[...]
    wr = wr_ref[...]
    if use_bf16_mxu and wl.dtype == jnp.float32:
        wl = wl.astype(jnp.bfloat16)
        wr = wr.astype(jnp.bfloat16)

    # Batched matmul over the head-block: (Hb,Ob,R) x (Hb,R,Tn) -> (Hb,Ob,Tn)
    w = lax.dot_general(
        wl, wr,
        dimension_numbers=(((2,), (1,)), ((0,), (0,))),
        preferred_element_type=jnp.float32,
    )

    if add_identity:
        row0 = pl.program_id(1) * out_block      # element row offset of this tile
        col0 = pl.program_id(2) * in_block       # element col offset of this tile
        # Diagonal element (k, k) exists for k < min(O, I); tile holds one iff
        # the row/col ranges of this tile overlap on the diagonal.
        tile_has_diag = jnp.logical_and(
            jnp.logical_and(row0 < col0 + in_block, col0 < row0 + out_block),
            jnp.logical_and(row0 < in_features, col0 < out_features),
        )

        @pl.when(tile_has_diag)
        def _():
            rows = lax.broadcasted_iota(jnp.int32, (out_block, in_block), 0) + row0
            cols = lax.broadcasted_iota(jnp.int32, (out_block, in_block), 1) + col0
            eye = jnp.where(rows == cols, jnp.float32(0.5), jnp.float32(0.0))
            out_ref[...] = (w + eye[None, :, :]).astype(out_ref.dtype)

        @pl.when(jnp.logical_not(tile_has_diag))
        def _():
            out_ref[...] = w.astype(out_ref.dtype)
    else:
        out_ref[...] = w.astype(out_ref.dtype)


# --------------------------------------------------------------------------
# Tile selection (generation / padding aware)
# --------------------------------------------------------------------------
def _padded_block_bytes(shape, itemsize):
    """VMEM footprint of a block including lane/sublane layout padding."""
    dims = list(shape)
    sublane = max(1, (8 * 4) // itemsize)        # 8 (f32), 16 (bf16), 32 (i8)
    dims[-1] = -(-dims[-1] // 128) * 128
    if len(dims) >= 2:
        dims[-2] = -(-dims[-2] // sublane) * sublane
    n = 1
    for d in dims:
        n *= d
    return n * itemsize


def _vmem_budget_bytes():
    """~45% of physical VMEM; conservative fallback if the query fails."""
    cap = 64 << 20
    try:
        info = pltpu.get_tpu_info()
        cap = int(getattr(info, "vmem_capacity_bytes", cap))
    except Exception:
        pass
    return (cap * 45) // 100, cap


def _choose_tiles(num_heads, out_features, in_features, rank,
                  out_itemsize, in_itemsize, budget):
    """Pick (heads_per_block, out_features_tile, in_features_tile, live_bytes).

    Preference order (all double-buffered, padding-aware):
      1. full (O, I) block, batch as many heads as fit (but keep >= 2 grid
         steps over heads so both v7x TensorCores get work),
      2. tile out_features (8-aligned divisors), keeping the output last dim
         lane-dense at full in_features,
      3. only then tile in_features with 128-multiple divisors.
    """

    def live_bytes(hb, ob, tn):
        return 2 * (  # x2: double buffering
            _padded_block_bytes((hb, ob, rank), in_itemsize)
            + _padded_block_bytes((hb, rank, tn), in_itemsize)
            + _padded_block_bytes((hb, ob, tn), out_itemsize)
        )

    def fits(hb, ob, tn):
        return live_bytes(hb, ob, tn) <= budget

    tn = in_features
    ob = out_features

    # 1) heads per block: largest divisor of num_heads within budget, capped so
    #    the heads grid axis keeps >= 2 steps (megacore utilization on v7x).
    hb_cap = num_heads // 2 if num_heads >= 2 else 1
    hb = 1
    for cand in range(num_heads, 0, -1):
        if num_heads % cand == 0 and cand <= hb_cap and fits(cand, ob, tn):
            hb = cand
            break

    if not fits(hb, ob, tn):
        hb = 1
        # 2) tile out_features (second-to-last dim, 8-aligned divisors),
        #    keeping the full-width lane-dense output rows.
        ob_cands = [d for d in range(out_features, 0, -1)
                    if out_features % d == 0 and (d % 8 == 0 or d == out_features)]
        chosen = None
        for cand in ob_cands:
            if fits(1, cand, tn):
                chosen = cand
                break
        ob = chosen if chosen is not None else (min(ob_cands) if ob_cands else out_features)

        if not fits(1, ob, tn) and in_features % 128 == 0:
            # 3) last resort: tile in_features with 128-multiple divisors.
            tn_cands = [d for d in range(in_features, 127, -128)
                        if in_features % d == 0]
            chosen = None
            for cand in tn_cands:
                if fits(1, ob, cand):
                    chosen = cand
                    break
            tn = chosen if chosen is not None else 128
        # TODO(synk): ragged (cdiv) tiling for in_features not a multiple of 128.

    return hb, ob, tn, live_bytes(hb, ob, tn)


# --------------------------------------------------------------------------
# Public wrapper
# --------------------------------------------------------------------------
def low_rank_fast_weight(w_left, w_right, *, add_identity=False,
                         out_dtype=None, use_bf16_mxu=False):
    """W = w_left @ w_right (+ 0.5 * I), per head, as a Pallas TPU kernel."""
    num_heads, out_features, rank = w_left.shape
    assert w_right.shape == (num_heads, rank, w_right.shape[-1])
    in_features = w_right.shape[-1]

    out_dtype = w_left.dtype if out_dtype is None else out_dtype
    out_itemsize = jnp.dtype(out_dtype).itemsize
    in_itemsize = jnp.dtype(w_left.dtype).itemsize

    budget, vmem_cap = _vmem_budget_bytes()
    hb, ob, tn, live_bytes = _choose_tiles(
        num_heads, out_features, in_features, rank,
        out_itemsize, in_itemsize, budget,
    )
    grid = (num_heads // hb, out_features // ob, in_features // tn)

    kernel = functools.partial(
        _lowrank_fw_kernel,
        add_identity=add_identity,
        out_block=ob,
        in_block=tn,
        out_features=out_features,
        in_features=in_features,
        use_bf16_mxu=use_bf16_mxu,
    )

    cost = pl.CostEstimate(
        flops=2 * num_heads * out_features * in_features * rank,
        transcendentals=0,
        bytes_accessed=(
            num_heads * out_features * rank * in_itemsize
            + num_heads * rank * in_features * in_itemsize
            + num_heads * out_features * in_features * out_itemsize
        ),
    )

    # vmem limit: enough for the live blocks + headroom, never above what the
    # chip physically has (minus safety margin).
    vmem_limit = max(32 << 20, live_bytes + (4 << 20))
    vmem_limit = int(max(16 << 20, min(vmem_limit, vmem_cap - (8 << 20))))

    return pl.pallas_call(
        kernel,
        out_shape=jax.ShapeDtypeStruct(
            (num_heads, out_features, in_features), out_dtype
        ),
        grid_spec=pltpu.PrefetchScalarGridSpec(
            num_scalar_prefetch=0,
            grid=grid,
            in_specs=[
                # w_left block constant across the in_features axis.
                pl.BlockSpec((hb, ob, rank), lambda h, o, j: (h, o, 0)),
                # w_right block constant across the out_features axis.
                pl.BlockSpec((hb, rank, tn), lambda h, o, j: (h, 0, j)),
            ],
            out_specs=pl.BlockSpec((hb, ob, tn), lambda h, o, j: (h, o, j)),
        ),
        compiler_params=pltpu.CompilerParams(
            # heads axis parallel -> megacore shards heads; each core keeps its
            # w_left tile resident across its j sweep (arbitrary axes).
            dimension_semantics=("parallel", "arbitrary", "arbitrary"),
            vmem_limit_bytes=vmem_limit,
        ),
        cost_estimate=cost,
    )(w_left, w_right)


def init_low_rank_fast_weight_params(key, num_heads, out_features, in_features,
                                     rank=32, init_gain=0.5, dtype=jnp.float32):
    """Deterministic param init matching LowRankFastWeight._init_weights()."""
    k_left, k_right = jax.random.split(key)
    w_left = jax.random.normal(k_left, (num_heads, out_features, rank), dtype) * (
        init_gain / math.sqrt(rank)
    )
    w_right = jax.random.normal(k_right, (num_heads, rank, in_features), dtype) * (
        init_gain / math.sqrt(in_features)
    )
    return w_left, w_right


if __name__ == "__main__":
    # Small, module-consistent shapes. in_features=128 keeps the output block
    # lane-dense (last dim multiple of 128).
    num_heads = 4
    out_features = 32
    in_features = 128
    rank = 16
    add_identity = True

    key = jax.random.PRNGKey(0)
    w_left, w_right = init_low_rank_fast_weight_params(
        key, num_heads, out_features, in_features, rank=rank, init_gain=0.5
    )

    # Pure-JAX reference
    W_ref = jnp.einsum("hor,hri->hoi", w_left, w_right)
    if add_identity:
        W_ref = W_ref + jnp.eye(out_features, in_features, dtype=W_ref.dtype)[None] * 0.5

    # 1) default path (f32 MXU inputs, f32 output) — tight tolerance.
    W = low_rank_fast_weight(w_left, w_right, add_identity=add_identity)
    W = jax.block_until_ready(W)
    assert W.shape == (num_heads, out_features, in_features)
    assert jnp.allclose(W, W_ref, atol=1e-5, rtol=1e-5), "mismatch vs reference (f32)"

    # 2) fast path (bf16 MXU inputs, bf16 output) — looser tolerance.
    W_bf16 = low_rank_fast_weight(
        w_left, w_right, add_identity=add_identity,
        out_dtype=jnp.bfloat16, use_bf16_mxu=True,
    )
    W_bf16 = jax.block_until_ready(W_bf16)
    assert jnp.allclose(W_bf16.astype(jnp.float32), W_ref, atol=2e-2, rtol=2e-2), (
        "mismatch vs reference (bf16)"
    )

    print("KERNEL_OK")
</pallas_src>

<mosaic_0001>
module attributes {stable_mosaic.version = 11 : i64} {
  func.func @_lowrank_fw_kernel(%arg0: i32, %arg1: i32, %arg2: i32, %arg3: memref<2x32x16xf32, #tpu.memory_space<vmem>>, %arg4: memref<2x16x128xf32, #tpu.memory_space<vmem>>, %arg5: memref<2x32x128xf32, #tpu.memory_space<vmem>>) attributes {dimension_semantics = [#tpu.dimension_semantics<parallel>, #tpu.dimension_semantics<arbitrary>, #tpu.dimension_semantics<arbitrary>], iteration_bounds = array<i64: 2, 1, 1>, scalar_prefetch = 0 : i64, scratch_operands = 0 : i64, tpu.core_type = #tpu.core_type<tc>, window_params = [{transform_indices = @transform_0, window_bounds = array<i64: 2, 32, 16>}, {transform_indices = @transform_1, window_bounds = array<i64: 2, 16, 128>}, {transform_indices = @transform_2, window_bounds = array<i64: 2, 32, 128>}]} {
    %c0 = arith.constant 0 : index
    %c0_0 = arith.constant 0 : index
    %c0_1 = arith.constant 0 : index
    %0 = vector.load %arg3[%c0, %c0_0, %c0_1] : memref<2x32x16xf32, #tpu.memory_space<vmem>>, vector<2x32x16xf32>
    %c0_2 = arith.constant 0 : index
    %c0_3 = arith.constant 0 : index
    %c0_4 = arith.constant 0 : index
    %1 = vector.load %arg4[%c0_2, %c0_3, %c0_4] : memref<2x16x128xf32, #tpu.memory_space<vmem>>, vector<2x16x128xf32>
    %cst = arith.constant dense<0.000000e+00> : vector<2x32x128xf32>
    %2 = tpu.matmul %0, %1, %cst {dimension_numbers = #tpu.dot_dimension_numbers<[2], [1], [1], [2], [0, 0, 0, 1, 1, 2], [0], [0]>} : vector<2x32x16xf32>, vector<2x16x128xf32>, vector<2x32x128xf32> -> vector<2x32x128xf32>
    %c32_i32 = arith.constant 32 : i32
    %3 = arith.muli %arg1, %c32_i32 : i32
    %c128_i32 = arith.constant 128 : i32
    %4 = arith.muli %arg2, %c128_i32 : i32
    %c128_i32_5 = arith.constant 128 : i32
    %5 = arith.addi %4, %c128_i32_5 : i32
    %6 = arith.cmpi slt, %3, %5 : i32
    %c32_i32_6 = arith.constant 32 : i32
    %7 = arith.addi %3, %c32_i32_6 : i32
    %8 = arith.cmpi slt, %4, %7 : i32
    %9 = arith.andi %6, %8 : i1
    %c128_i32_7 = arith.constant 128 : i32
    %10 = arith.cmpi slt, %3, %c128_i32_7 : i32
    %c32_i32_8 = arith.constant 32 : i32
    %11 = arith.cmpi slt, %4, %c32_i32_8 : i32
    %12 = arith.andi %10, %11 : i1
    %13 = arith.andi %9, %12 : i1
    %14 = arith.extui %13 : i1 to i32
    %c0_i32 = arith.constant 0 : i32
    %15 = arith.cmpi ne, %14, %c0_i32 : i32
    scf.if %15 {
      %19 = tpu.iota {dimensions = array<i32: 0>} : vector<32x128xi32>
      %20 = vector.broadcast %3 : i32 to vector<32x128xi32>
      %21 = arith.addi %19, %20 : vector<32x128xi32>
      %22 = tpu.iota {dimensions = array<i32: 1>} : vector<32x128xi32>
      %23 = vector.broadcast %4 : i32 to vector<32x128xi32>
      %24 = arith.addi %22, %23 : vector<32x128xi32>
      %25 = arith.cmpi eq, %21, %24 : vector<32x128xi32>
      %cst_10 = arith.constant 5.000000e-01 : f32
      %cst_11 = arith.constant 0.000000e+00 : f32
      %26 = vector.broadcast %cst_10 : f32 to vector<32x128xf32>
      %27 = vector.broadcast %cst_11 : f32 to vector<32x128xf32>
      %28 = arith.select %25, %26, %27 : vector<32x128xi1>, vector<32x128xf32>
      %29 = vector.shape_cast %28 : vector<32x128xf32> to vector<1x32x128xf32>
      %30 = vector.broadcast %29 : vector<1x32x128xf32> to vector<2x32x128xf32>
      %31 = arith.addf %2, %30 : vector<2x32x128xf32>
      %c0_12 = arith.constant 0 : index
      %c0_13 = arith.constant 0 : index
      %c0_14 = arith.constant 0 : index
      %32 = vector.load %arg5[%c0_12, %c0_13, %c0_14] : memref<2x32x128xf32, #tpu.memory_space<vmem>>, vector<2x32x128xf32>
      tpu.vector_store %arg5[%c0_12, %c0_13, %c0_14], %31 {strides = array<i32>} : memref<2x32x128xf32, #tpu.memory_space<vmem>>, vector<2x32x128xf32>,
    } else {
    }
    %true = arith.constant true
    %16 = arith.xori %13, %true : i1
    %17 = arith.extui %16 : i1 to i32
    %c0_i32_9 = arith.constant 0 : i32
    %18 = arith.cmpi ne, %17, %c0_i32_9 : i32
    scf.if %18 {
      %c0_10 = arith.constant 0 : index
      %c0_11 = arith.constant 0 : index
      %c0_12 = arith.constant 0 : index
      %19 = vector.load %arg5[%c0_10, %c0_11, %c0_12] : memref<2x32x128xf32, #tpu.memory_space<vmem>>, vector<2x32x128xf32>
      tpu.vector_store %arg5[%c0_10, %c0_11, %c0_12], %2 {strides = array<i32>} : memref<2x32x128xf32, #tpu.memory_space<vmem>>, vector<2x32x128xf32>,
    } else {
    }
    return
  }
  func.func @transform_0(%arg0: i32, %arg1: i32, %arg2: i32) -> (i32, i32, i32) {
    %c0_i32 = arith.constant 0 : i32
    %c0_i32_0 = arith.constant 0 : i32
    return %arg0, %arg1, %c0_i32 : i32, i32, i32
  }
  func.func @transform_1(%arg0: i32, %arg1: i32, %arg2: i32) -> (i32, i32, i32) {
    %c0_i32 = arith.constant 0 : i32
    %c0_i32_0 = arith.constant 0 : i32
    return %arg0, %c0_i32, %arg2 : i32, i32, i32
  }
  func.func @transform_2(%arg0: i32, %arg1: i32, %arg2: i32) -> (i32, i32, i32) {
    %c0_i32 = arith.constant 0 : i32
    return %arg0, %arg1, %arg2 : i32, i32, i32
  }
}

</mosaic_0001>

<bundles_post_ra>
// kernel: tpu_custom_call.1
= control target key start
LH: loop header
LB: loop body
LE: loop exit
PB: predicated region body
PF: predicated region fallthrough
CT: control target
= control target key end

     0   :  { %7 = vsyncpa [#allocation3], 0  ;;  %s971_s0 = inlined_call_operand.vmem [shape: f32[4,32,16], index: 0, kind: input, shape index: {}]   ;;  %s972_s1 = inlined_call_operand.vmem [shape: f32[4,16,128], index: 1, kind: input, shape index: {}]   ;;  %s973_s2 = inlined_call_operand.hbm [shape: f32[4,32,128], index: 2, kind: output, shape index: {}]  }
   0x1   :  { %9 = vsyncpa [#allocation3 + $0x1], 0  ;;  %s842_s9 = smov 0   ;;  %s844_s10 = smov 0  }
   0x2   :  { %s846_s11 = smov 0   ;;  %s848_s12 = smov 0  }
   0x3   :  { %s850_s13 = smov 0   ;;  %s852_s14 = smov 0  }
   0x4 LB: > { %s615_s15 = sadd.s32 4294967295, %s821_s14   ;;  %s616_s16 = sadd.s32 4294967294, %s821_s14   ;;  %s821_s14 = sphi %s852_s14, %s15_s14   ;;  %s817_s13 = sphi %s850_s13, %s980_s13   ;;  %s813_s12 = sphi %s848_s12, %s979_s12   ;;  %s809_s11 = sphi %s846_s11, %s978_s11   ;;  %s805_s10 = sphi %s844_s10, %s977_s10   ;;  %s801_s9 = sphi %s842_s9, %s976_s9  }
   0x5   : > { %s34_s17 = sadd.s32 1, %s817_s13  ;;  %s101_s18 = sadd.s32 1, %s809_s11 }
   0x6   : > { %p36_p0 = scmp.ge.s32.totalorder %s34_s17, 2  ;;  %p111_p1 = scmp.ne.s32.totalorder %s809_s11, %s805_s10 }
   0x7   : > { %p112_p2 = scmp.eq.s32.totalorder %s615_s15, 1  ;;  %p117_p3 = scmp.ne.s32.totalorder %s805_s10, %s801_s9 }
   0x8   : > { %s982_s17 = smov (%p36_p0, %s34_s17), 0  ;;  %p118_p5 = scmp.eq.s32.totalorder %s616_s16, 1 }
   0x9   : > { %p882_p4 = por %p112_p2, %p111_p1  ;;  %s94_s20 = ssub.s32 %s817_s13, %s982_s17 }
   0xa   : > { %p619_p6 = scmp.ge.s32.totalorder %s821_s14, 1  ;;  %p99_p7 = scmp.eq.s32.totalorder %s94_s20, 0 }
   0xb   : > { %p889_p8 = por %p118_p5, %p117_p3  ;;  %p164_p9 = scmp.lt.s32.totalorder %s821_s14, 3 }
   0xc   : > { %s895_s22 = scalar_select %p99_p7, %s809_s11, %s101_s18  }
   0xd   : > { %p165_p10 = pnand %p619_p6, %p164_p9 }
   0xe   : > { %s621_s23 = sshll.u32 (!%p165_p10), %s813_s12, 1  ;;  %vm236_vm0 = vcmask (!%p165_p10), 130048   ;;  %v447_v14 = vlaneseq (!%p165_p10)  ;;  %s197_s4 = sand.u32 (!%p165_p10), 1, %s805_s10   ;;  %v823_v20 = vmov (!%p165_p10), 0.0  }
   0xf   : > { %168 = sbr.rel (%p165_p10) target bundleno = 267 (0x10b), region = 28  ;;  %p202_p11 = scmp.lt.s32.totalorder (!%p165_p10), %s621_s23, 3 }
  0x10   : > { %v448_v15 = vshrl.u32 (!%p165_p10), %v447_v14, 7  ;;  %v458_v17 = vand.u32 (!%p165_p10), 127, %v447_v14  ;;  %s620_s5 = sshll.u32 (!%p165_p10), %s197_s4, 6  ;;  %s644_s7 = sshll.u32 (!%p165_p10), %s813_s12, 10 }
  0x11   : > { %s199_s6 = scalar_lea.vmem (!%p165_p10), [#allocation2], %s620_s5  ;;  %s919_s18 = scalar_lea.hbm (!%p165_p10), %s973_s2, %s644_s7 }
  0x12   : > { %v449_v16 = vadd.s32 (!%p165_p10), 8, %v448_v15  ;;  %v451_v18 = vadd.s32 (!%p165_p10), 24, %v448_v15  ;;  %vm461_vm2 = vcmp.eq.s32.totalorder (!%p165_p10), %v448_v15, %v458_v17  ;;  %v450_v19 = vadd.s32 (!%p165_p10), 16, %v448_v15  ;;  %s514_s8 = sshll.u32 (!%p165_p10), %s199_s6, 4  ;;  %s925_s12 = scalar_lea.sflag (!%p165_p10), [#allocation3], %s197_s4  ;;  %s921_s8 = int_to_ptr.vmem [resolvable:$true] %s514_s8 }
  0x13   : > { %v465_v22 = vsel (!%p165_p10), %vm461_vm2, 0.5, %v823_v20  ;;  %s743_s20 = scalar_lea.vmem (!%p165_p10), %s921_s8, 1024 }
  0x14   : > { %vm462_vm1 = vcmp.eq.s32.totalorder (!%p165_p10), %v449_v16, %v458_v17  ;;  %vm464_vm3 = vcmp.eq.s32.totalorder (!%p165_p10), %v451_v18, %v458_v17  ;;  %vm463_vm4 = vcmp.eq.s32.totalorder (!%p165_p10), %v450_v19, %v458_v17  ;;  %p744_p12 = scmp.ne.s32.totalorder (!%p165_p10), %s921_s8, %s743_s20 }
  0x15   : > { %v466_v21 = vsel (!%p165_p10), %vm462_vm1, 0.5, %v823_v20  ;;  %v468_v30 = vsel (!%p165_p10), %vm464_vm3, 0.5, %v823_v20  ;;  %v467_v32 = vsel (!%p165_p10), %vm463_vm4, 0.5, %v823_v20 }
  0x16   : > { %s984_s23 = smov (!%p202_p11, %s621_s23), 3  ;;  %p745_p13 = pnand %p744_p12, %p882_p4 }
  0x17   : > { %s641_s24 = sshll.u32 %s984_s23, 5  ;;  %s642_s25 = sshll.u32 %s984_s23, 4 }
  0x18   : > { %s209_s28 = scalar_lea.vmem %s971_s0, %s641_s24  ;;  %s220_s3 = scalar_lea.vmem %s972_s1, %s642_s25 }
  0x19   : > { %v232_v0 = vld [vmem:[%s220_s3] sm:$0xff]  ;;  %v233_v1 = vld [vmem:[%s220_s3 + $0x8] sm:$0xff]  ;;  %v234_v2 = vld [vmem:[%s220_s3 + $0x10] sm:$0xff]  ;;  %p746_p0 = pneg %p745_p13  ;;  %s824_s23 = smov [#allocation2]  }
  0x1a   : > { %v677_v3 = vpack.c.bf16 %v233_v1, %v232_v0  ;;  %v235_v4 = vld [vmem:[%s220_s3 + $0x18] sm:$0xff]  ;;  %v224_v5 = vld [vmem:[%s209_s28] sm:$0xff]  ;;  %v225_v8 = vld [vmem:[%s209_s28 + $0x8] sm:$0xff]  ;;  %s747_s24 = sshll.u32 %s824_s23, 4  ;;  %s748_s24 = int_to_ptr.vmem [resolvable:$false] %s747_s24 }
  0x1b   : > { %v228_v6 = vld [vmem:[%s209_s28 + $0x20] sm:$0xff]  ;;  %v681_v7 = vpack.c.bf16 %v235_v4, %v234_v2  ;;  %661 = vmatprep.mubr.msk.f32.mxu0 %vm236_vm0, %v224_v5  ;;  %v229_v9 = vld [vmem:[%s209_s28 + $0x28] sm:$0xff]  ;;  %v226_v10 = vld [vmem:[%s209_s28 + $0x10] sm:$0xff]  ;;  %s749_s25 = scalar_lea.vmem %s748_s24, 2048  ;;  %p750_p1 = scmp.lt.s32.totalorder %s921_s8, %s748_s24 }
  0x1c   : > { %671 = vmatprep.mubr.msk.f32.mxu1 %vm236_vm0, %v228_v6  ;;  %678 = vmatprep.subr.bf16.mxu0 %v677_v3  ;;  %v230_v11 = vld [vmem:[%s209_s28 + $0x30] sm:$0xff]  ;;  %v227_v12 = vld [vmem:[%s209_s28 + $0x18] sm:$0xff]  ;;  %p751_p2 = scmp.lt.s32.totalorder %s749_s25, %s743_s20 }
  0x1d   : > { %682 = vmatprep.subr.bf16.mxu1 %v681_v7  ;;  %680 = vmatpush3.bf16.msra.mxu0 %v677_v3  ;;  %v231_v13 = vld [vmem:[%s209_s28 + $0x38] sm:$0xff] }
  0x1e   : > { %684 = vmatpush3.bf16.msra.mxu1 %v681_v7  ;;  %p752_p3 = por %p751_p2, %p750_p1 }
  0x20   : > { %662 = vmatmul.mubr.msk.f32.vlgmr.msra.gmra.mrb[0].mxu0 %vm236_vm0, %v225_v8  ;;  %p753_p5 = pnand %p752_p3, %p746_p0 }
  0x21   : > { %672 = vmatmul.mubr.msk.f32.vlgmr.msra.gmra.mrb[0].mxu1 %vm236_vm0, %v229_v9  ;;  %664 = vmatprep.mubr.msk.f32.mxu0 %vm236_vm0, %v226_v10 }
  0x22   : > { %674 = vmatprep.mubr.msk.f32.mxu1 %vm236_vm0, %v230_v11 }
  0x24   : > { %665 = vmatmul.mubr.msk.f32.gmra.mrb[2].mxu0 %vm236_vm0, %v227_v12 }
  0x25   : > { %675 = vmatmul.mubr.msk.f32.gmra.mrb[2].mxu1 %vm236_vm0, %v231_v13 }
  0xf3   : > { %v663_v23 = vpop.f32.mrb[0].mxu0 }
  0xf4   : > { %v470_v24 = vadd.f32 %v663_v23, %v466_v21  ;;  %v673_v25 = vpop.f32.mrb[0].mxu1  ;;  %v315_v26 = vpop.f32.mrb[1].mxu0 }
  0xf5   : > { %v474_v27 = vadd.f32 %v673_v25, %v466_v21  ;;  %v469_v28 = vadd.f32 %v465_v22, %v315_v26  ;;  %v412_v29 = vpop.f32.mrb[1].mxu1 }
  0xf6   : > { %478 = vst [vmem:[%s199_s6 + $0x8] sm:$0xff] %v470_v24  ;;  %v473_v31 = vadd.f32 %v465_v22, %v412_v29 }
  0xf7   : > { %482 = vst [vmem:[%s199_s6 + $0x28] sm:$0xff] %v474_v27  ;;  %477 = vst [vmem:[%s199_s6] sm:$0xff] %v469_v28  ;;  %v666_v33 = vpop.f32.mrb[2].mxu0 }
  0xf8   : > { %481 = vst [vmem:[%s199_s6 + $0x20] sm:$0xff] %v473_v31  ;;  %v472_v34 = vadd.f32 %v666_v33, %v468_v30  ;;  %v676_v35 = vpop.f32.mrb[2].mxu1  ;;  %v325_v36 = vpop.f32.mrb[3].mxu0 }
  0xf9   : > { %v476_v37 = vadd.f32 %v676_v35, %v468_v30  ;;  %v471_v38 = vadd.f32 %v467_v32, %v325_v36  ;;  %v422_v39 = vpop.f32.mrb[3].mxu1 }
  0xfa   : > { %480 = vst [vmem:[%s199_s6 + $0x18] sm:$0xff] %v472_v34  ;;  %v475_v40 = vadd.f32 %v467_v32, %v422_v39 }
  0xfb   : > { %484 = vst [vmem:[%s199_s6 + $0x38] sm:$0xff] %v476_v37  ;;  %479 = vst [vmem:[%s199_s6 + $0x10] sm:$0xff] %v471_v38 }
  0xfc   : > { %483 = vst [vmem:[%s199_s6 + $0x30] sm:$0xff] %v475_v40 }
  0xfd   : > { %756 = shalt.err (!%p753_p5)
}
  0xfe   : > { %s757_s26 = scalar_lea.hbm %s919_s18, 1024  ;;  %s761_s29 = scalar_lea.hbm %s973_s2, 2048 }
  0xff   : > { %p758_p6 = scmp.ne.s32.totalorder %s919_s18, %s757_s26  ;;  %p762_p10 = scmp.lt.u32.totalorder %s919_s18, %s973_s2 }
 0x100   : > { %p763_p11 = scmp.lt.u32.totalorder %s761_s29, %s757_s26  ;;  %p765_p13 = scmp.lt.u32.totalorder %s757_s26, %s919_s18 }
 0x101   : > { %p759_p7 = pnand %p758_p6, %p882_p4 }
 0x102   : > { %p764_p12 = por %p763_p11, %p762_p10 }
 0x103   : > { %p760_p9 = pneg %p759_p7 }
 0x104   : > { %p766_p0 = por %p765_p13, %p764_p12 }
 0x106   : > { %p767_p1 = pnand %p766_p0, %p760_p9 }
 0x108   : > { %770 = shalt.err (!%p767_p1)
}
 0x109   : > { %s825_s4 = smov 128   ;;  %s826_s5 = smov 8  }
 0x10a   : > { %685 = dma.vmem_to_hbm [thread:$0]  (%p882_p4), %s921_s8, 1024, %s919_s18, %s925_s12, %s825_s4, %s825_s4, %s826_s5  }
 0x10b PF: > { %p691_p2 = scmp.ge.s32.totalorder %s821_s14, 2  ;;  %s529_s6 = sand.u32 1, %s801_s9  }
 0x10c   : > { %s530_s7 = scalar_lea.sflag [#allocation3], %s529_s6 }
 0x10d   : > { %p688_p3 = pnand %p691_p2, %p889_p8 }
 0x10f   : > { %796 = dma.done.wait (!%p688_p3), %s530_s7, 1024  }
 0x110   : > { %798 = vsyncadd (!%p688_p3), %s530_s7, 4294966272  ;;  %s15_s14 = sadd.s32 1, %s821_s14   ;;  %s976_s9 = smov %s805_s10 }
 0x111   : > { %p12_p5 = scmp.ge.s32.totalorder %s15_s14, 4   ;;  %s977_s10 = smov %s809_s11 }
 0x112   : > { %s978_s11 = smov %s895_s22  ;;  %s979_s12 = smov %s817_s13 }
 0x113   : > { %s980_s13 = smov %s982_s17  ;;  %14 = sbr.rel (!%p12_p5) target bundleno = 4 (0x4), region = 74 }
 0x11a   :  { %535 = vsyncpa [#allocation3], 1 }
 0x11b   :  { %537 = vsyncpa [#allocation3 + $0x1], 1 }

</bundles_post_ra>
